<compile_context>
chip_gen: v5e
topology: v5e:2x2
jax: 0.10.0
libtpu: 0.0.40
codegen_flags: <defaults>
</compile_context>

<pallas_src>
import functools

import numpy as np
import jax
import jax.numpy as jnp
from jax.experimental import pallas as pl
from jax.experimental.pallas import tpu as pltpu


# ----------------------------------------------------------------------------- fused kernel
def _vgg_frontend_kernel(x_ref, m_ref,
                         t1_ref, w1e_ref, w1o_ref, b1_ref,
                         t2_ref, w2_ref, b2_ref,
                         t3_ref, w3_ref, b3_ref,
                         t4_ref, w4_ref, b4_ref,
                         wl_ref, bl_ref, pm_ref,
                         o_ref, mo_ref):
    """Whole VGG4LayerPoolFrontendV1 forward in one kernel invocation.

    Activations are 2D and lane-dense: rows = B*T_layer, lanes = F*C_layer.
    t*_ref: [3, rows_out, rows_in] 0/1 matrices realizing the three time taps of
            each 3x3 conv (T zero-padding, T stride, batch boundaries folded in).
    w*_ref: banded [3*F*Ci, F*Co] weights realizing F taps + F padding + channel
            mixing, so each conv layer is a single MXU matmul.
    """
    dot = functools.partial(jnp.dot, preferred_element_type=jnp.float32)

    def taps(t_ref, a):
        # im2col patch [rows_out, 3*lanes]: rows (t-1, t, t+1) at this conv's T-stride.
        return jnp.concatenate(
            [dot(t_ref[0], a), dot(t_ref[1], a), dot(t_ref[2], a)], axis=1)

    # conv1 (3x3, pad 1, Cin=1) + ReLU + MaxPool2d((1, 2)) fused in the epilogue.
    p1 = taps(t1_ref, x_ref[...])                                     # [B*T, 3F]
    y_even = dot(p1, w1e_ref[...]) + b1_ref[...]                      # conv1 at even F
    y_odd = dot(p1, w1o_ref[...]) + b1_ref[...]                       # conv1 at odd  F
    a1 = jnp.maximum(jnp.maximum(y_even, y_odd), 0.0)                 # [B*T, (F/2)*C1]

    # conv2 (3x3, pad 1, stride (2,1)) + ReLU.
    a2 = jnp.maximum(dot(taps(t2_ref, a1), w2_ref[...]) + b2_ref[...], 0.0)   # [B*T/2, (F/2)*C2]

    # conv3 (3x3, pad 1, stride (2,1)) + ReLU.
    a3 = jnp.maximum(dot(taps(t3_ref, a2), w3_ref[...]) + b3_ref[...], 0.0)   # [B*T/4, (F/2)*C3]

    # conv4 (3x3, pad 1), no activation.
    a4 = dot(taps(t4_ref, a3), w4_ref[...]) + b4_ref[...]             # [B*T/4, (F/2)*C4]

    # linear: the torch transpose(1,2)+flatten is folded into wl's row order.
    o_ref[...] = (dot(a4, wl_ref[...]) + bl_ref[...]).astype(o_ref.dtype)

    # sequence mask: both max_pool1d(k=3, s=2, p=1) steps as one counting matmul.
    mo_ref[...] = dot(m_ref[...], pm_ref[...]).astype(mo_ref.dtype)


# ----------------------------------------------------------------------------- parameter prep
def prepare_frontend_params(params, B, T, F):
    """One-time host-side prep: fold conv taps / stride / padding / pooling and
    the pre-linear transpose into small dense matrices for the fused kernel."""
    w1 = np.asarray(params["w1"], np.float32); b1 = np.asarray(params["b1"], np.float32)
    w2 = np.asarray(params["w2"], np.float32); b2 = np.asarray(params["b2"], np.float32)
    w3 = np.asarray(params["w3"], np.float32); b3 = np.asarray(params["b3"], np.float32)
    w4 = np.asarray(params["w4"], np.float32); b4 = np.asarray(params["b4"], np.float32)
    wl = np.asarray(params["wl"], np.float32); bl = np.asarray(params["bl"], np.float32)

    K = w1.shape[0]                              # conv kernel size (3)
    pad = (K - 1) // 2                           # conv padding (1)
    C1, C2, C3, C4 = w1.shape[3], w2.shape[3], w3.shape[3], w4.shape[3]
    Fp = (F - 2) // 2 + 1                        # F after MaxPool2d((1, 2))
    T1o = (T + 2 * pad - K) // 1 + 1             # conv1 output T (= T)
    T2o = (T1o + 2 * pad - K) // 2 + 1           # conv2 output T
    T3o = (T2o + 2 * pad - K) // 2 + 1           # conv3 output T
    T4o = (T3o + 2 * pad - K) // 1 + 1           # conv4 output T (= T3o)

    def tap_mats(t_in, t_out, stride):
        # 0/1 matrices: row (b, to) selects input row (b, to*stride + kh - pad).
        ts = np.zeros((K, B * t_out, B * t_in), np.float32)
        for kh in range(K):
            for b in range(B):
                for to in range(t_out):
                    ti = to * stride + kh - pad
                    if 0 <= ti < t_in:
                        ts[kh, b * t_out + to, b * t_in + ti] = 1.0
        return ts

    # conv1 with the (1,2) pool folded in: separate weights for even / odd F outputs.
    w1e = np.zeros((K * F, Fp * C1), np.float32)
    w1o = np.zeros((K * F, Fp * C1), np.float32)
    for kh in range(K):
        for kw in range(K):
            for fp in range(Fp):
                fe = 2 * fp + kw - pad
                fo = 2 * fp + 1 + kw - pad
                for c in range(C1):
                    if 0 <= fe < F:
                        w1e[kh * F + fe, fp * C1 + c] = w1[kh, kw, 0, c]
                    if 0 <= fo < F:
                        w1o[kh * F + fo, fp * C1 + c] = w1[kh, kw, 0, c]

    def banded(w, ci, co):
        # [3*Fp*ci, Fp*co]: F taps + F zero-padding + channel mixing in one matrix.
        wb = np.zeros((K * Fp * ci, Fp * co), np.float32)
        for kh in range(K):
            for kw in range(K):
                for f_out in range(Fp):
                    f_in = f_out + kw - pad
                    if 0 <= f_in < Fp:
                        r0 = kh * Fp * ci + f_in * ci
                        c0 = f_out * co
                        wb[r0:r0 + ci, c0:c0 + co] = w[kh, kw]
        return wb

    def bias_vec(b, f):
        return np.tile(b[None, :], (f, 1)).reshape(1, -1)

    # linear: torch does [B,C,T,F] -> transpose(1,2) -> flatten => index c*Fp + f;
    # our conv4 lanes are f*C4 + c, so permute the weight rows once.
    perm = np.array([c * Fp + f for f in range(Fp) for c in range(C4)], np.int64)
    wl_perm = wl[perm, :]

    def pool_mat(t_in):
        # max_pool1d(kernel=3, stride=2, padding=1) as a 0/1 "window membership" matrix.
        t_out = (t_in + 2 * pad - K) // 2 + 1
        pm = np.zeros((t_in, t_out), np.float32)
        for to in range(t_out):
            for kh in range(K):
                ti = 2 * to + kh - pad
                if 0 <= ti < t_in:
                    pm[ti, to] = 1.0
        return pm

    prep = dict(
        t1=tap_mats(T, T1o, 1), w1e=w1e, w1o=w1o, b1=bias_vec(b1, Fp),
        t2=tap_mats(T1o, T2o, 2), w2=banded(w2, C1, C2), b2=bias_vec(b2, Fp),
        t3=tap_mats(T2o, T3o, 2), w3=banded(w3, C2, C3), b3=bias_vec(b3, Fp),
        t4=tap_mats(T3o, T4o, 1), w4=banded(w4, C3, C4), b4=bias_vec(b4, Fp),
        wl=wl_perm, bl=bl[None, :],
        pm=pool_mat(T) @ pool_mat(T2o),           # both mask pools composed (counts)
    )
    return {k: jnp.asarray(v) for k, v in prep.items()}


# ----------------------------------------------------------------------------- forward
def pallas_forward(x_btf, sequence_mask, prep):
    """Mirrors VGG4LayerPoolFrontendV1.forward: ([B,T,F], [B,T]) -> ([B,T'',D], [B,T''])."""
    B, T, F = x_btf.shape
    t_out = prep["pm"].shape[1]
    d_out = prep["wl"].shape[1]

    vmem = lambda: pl.BlockSpec(memory_space=pltpu.MemorySpace.VMEM)
    args = (x_btf.reshape(B * T, F), sequence_mask.astype(jnp.float32),
            prep["t1"], prep["w1e"], prep["w1o"], prep["b1"],
            prep["t2"], prep["w2"], prep["b2"],
            prep["t3"], prep["w3"], prep["b3"],
            prep["t4"], prep["w4"], prep["b4"],
            prep["wl"], prep["bl"], prep["pm"])

    out, mask_counts = pl.pallas_call(
        _vgg_frontend_kernel,
        out_shape=(jax.ShapeDtypeStruct((B * t_out, d_out), x_btf.dtype),
                   jax.ShapeDtypeStruct((B, t_out), jnp.float32)),
        in_specs=[vmem() for _ in args],
        out_specs=(vmem(), vmem()),
    )(*args)

    # Trivial glue: contiguous view + boolean threshold of the pooled-mask counts.
    return out.reshape(B, t_out, d_out), mask_counts > 0.5


# ----------------------------------------------------------------------------- reference (pure JAX / XLA)
def _ref_mask_pool(mask, k, s, p):
    m = mask.astype(jnp.float32)
    m = jax.lax.reduce_window(m, -jnp.inf, jax.lax.max, (1, k), (1, s), [(0, 0), (p, p)])
    return m > 0.0


def ref_forward(x_btf, sequence_mask, p):
    x = x_btf[:, None, :, :]                                          # NCHW

    def conv(x, w_hwio, b, stride):
        w_oihw = jnp.transpose(w_hwio, (3, 2, 0, 1))
        y = jax.lax.conv_general_dilated(
            x, w_oihw, window_strides=stride, padding=[(1, 1), (1, 1)],
            dimension_numbers=("NCHW", "OIHW", "NCHW"),
            precision=jax.lax.Precision.HIGHEST)
        return y + b[None, :, None, None]

    x = jax.nn.relu(conv(x, p["w1"], p["b1"], (1, 1)))
    x = jax.lax.reduce_window(x, -jnp.inf, jax.lax.max, (1, 1, 1, 2), (1, 1, 1, 2), "VALID")
    x = conv(x, p["w2"], p["b2"], (2, 1))
    sequence_mask = _ref_mask_pool(sequence_mask, 3, 2, 1)
    x = jax.nn.relu(x)
    x = conv(x, p["w3"], p["b3"], (2, 1))
    sequence_mask = _ref_mask_pool(sequence_mask, 3, 2, 1)
    x = jax.nn.relu(x)
    x = conv(x, p["w4"], p["b4"], (1, 1))
    x = jnp.transpose(x, (0, 2, 1, 3))                                # [B, T, C, F]
    x = x.reshape(x.shape[0], x.shape[1], -1)
    x = jnp.einsum("btd,de->bte", x, p["wl"],
                   precision=jax.lax.Precision.HIGHEST) + p["bl"]
    return x, sequence_mask


# ----------------------------------------------------------------------------- main
if __name__ == "__main__":
    # Config (small, consistent with the module): conv channels 4/8/8/8,
    # conv kernel 3 (padding 1), pool kernel (1,2), conv2/conv3 stride (2,1),
    # activation ReLU, linear 64 -> 32.
    B, T, F = 2, 16, 16
    C1, C2, C3, C4 = 4, 8, 8, 8
    K = 3
    LIN_OUT = 32

    key = jax.random.PRNGKey(0)
    keys = jax.random.split(key, 11)

    def uinit(k, shape, fan_in):
        bound = 1.0 / np.sqrt(fan_in)
        return jax.random.uniform(k, shape, jnp.float32, -bound, bound)

    F_pool = F // 2                      # pool halves the feature dim
    LIN_IN = C4 * F_pool                 # 8 * 8 = 64

    params = {
        "w1": uinit(keys[0], (K, K, 1, C1), 1 * K * K),
        "b1": uinit(keys[1], (C1,), 1 * K * K),
        "w2": uinit(keys[2], (K, K, C1, C2), C1 * K * K),
        "b2": uinit(keys[3], (C2,), C1 * K * K),
        "w3": uinit(keys[4], (K, K, C2, C3), C2 * K * K),
        "b3": uinit(keys[5], (C3,), C2 * K * K),
        "w4": uinit(keys[6], (K, K, C3, C4), C3 * K * K),
        "b4": uinit(keys[7], (C4,), C3 * K * K),
        "wl": uinit(keys[8], (LIN_IN, LIN_OUT), LIN_IN),   # already [in, out] (torch W.T)
        "bl": uinit(keys[9], (LIN_OUT,), LIN_IN),
    }

    x = jax.random.normal(keys[10], (B, T, F), jnp.float32)
    lengths = jnp.array([T, 11], jnp.int32)
    sequence_mask = jnp.arange(T)[None, :] < lengths[:, None]         # [B, T] bool

    prep = prepare_frontend_params(params, B, T, F)                   # one-time folding

    out, out_mask = pallas_forward(x, sequence_mask, prep)
    out = jax.block_until_ready(out)
    out_mask = jax.block_until_ready(out_mask)

    ref, ref_mask = ref_forward(x, sequence_mask, params)

    assert out.shape == (B, T // 4, LIN_OUT), out.shape
    assert out_mask.shape == (B, T // 4), out_mask.shape
    np.testing.assert_allclose(np.asarray(out), np.asarray(ref), rtol=2e-2, atol=2e-2)
    assert np.array_equal(np.asarray(out_mask), np.asarray(ref_mask))

    print("KERNEL_OK")
</pallas_src>

<mosaic_0001>
module attributes {stable_mosaic.version = 11 : i64} {
  func.func @_vgg_frontend_kernel(%arg0: memref<32x16xf32, #tpu.memory_space<vmem>>, %arg1: memref<2x16xf32, #tpu.memory_space<vmem>>, %arg2: memref<3x32x32xf32, #tpu.memory_space<vmem>>, %arg3: memref<48x32xf32, #tpu.memory_space<vmem>>, %arg4: memref<48x32xf32, #tpu.memory_space<vmem>>, %arg5: memref<1x32xf32, #tpu.memory_space<vmem>>, %arg6: memref<3x16x32xf32, #tpu.memory_space<vmem>>, %arg7: memref<96x64xf32, #tpu.memory_space<vmem>>, %arg8: memref<1x64xf32, #tpu.memory_space<vmem>>, %arg9: memref<3x8x16xf32, #tpu.memory_space<vmem>>, %arg10: memref<192x64xf32, #tpu.memory_space<vmem>>, %arg11: memref<1x64xf32, #tpu.memory_space<vmem>>, %arg12: memref<3x8x8xf32, #tpu.memory_space<vmem>>, %arg13: memref<192x64xf32, #tpu.memory_space<vmem>>, %arg14: memref<1x64xf32, #tpu.memory_space<vmem>>, %arg15: memref<64x32xf32, #tpu.memory_space<vmem>>, %arg16: memref<1x32xf32, #tpu.memory_space<vmem>>, %arg17: memref<16x4xf32, #tpu.memory_space<vmem>>, %arg18: memref<8x32xf32, #tpu.memory_space<vmem>>, %arg19: memref<2x4xf32, #tpu.memory_space<vmem>>) attributes {dimension_semantics = [], scalar_prefetch = 0 : i64, scratch_operands = 0 : i64, tpu.core_type = #tpu.core_type<tc>} {
    %c0 = arith.constant 0 : index
    %c0_0 = arith.constant 0 : index
    %0 = vector.load %arg0[%c0, %c0_0] : memref<32x16xf32, #tpu.memory_space<vmem>>, vector<32x16xf32>
    %c0_1 = arith.constant 0 : index
    %c0_2 = arith.constant 0 : index
    %c0_3 = arith.constant 0 : index
    %1 = vector.load %arg2[%c0_1, %c0_2, %c0_3] : memref<3x32x32xf32, #tpu.memory_space<vmem>>, vector<1x32x32xf32>
    %2 = vector.shape_cast %1 : vector<1x32x32xf32> to vector<32x32xf32>
    %cst = arith.constant dense<0.000000e+00> : vector<32x16xf32>
    %3 = tpu.matmul %2, %0, %cst {dimension_numbers = #tpu.dot_dimension_numbers<[1], [0], [0], [1], [0, 0, 1, 1], [], []>} : vector<32x32xf32>, vector<32x16xf32>, vector<32x16xf32> -> vector<32x16xf32>
    %c1 = arith.constant 1 : index
    %c0_4 = arith.constant 0 : index
    %c0_5 = arith.constant 0 : index
    %4 = vector.load %arg2[%c1, %c0_4, %c0_5] : memref<3x32x32xf32, #tpu.memory_space<vmem>>, vector<1x32x32xf32>
    %5 = vector.shape_cast %4 : vector<1x32x32xf32> to vector<32x32xf32>
    %cst_6 = arith.constant dense<0.000000e+00> : vector<32x16xf32>
    %6 = tpu.matmul %5, %0, %cst_6 {dimension_numbers = #tpu.dot_dimension_numbers<[1], [0], [0], [1], [0, 0, 1, 1], [], []>} : vector<32x32xf32>, vector<32x16xf32>, vector<32x16xf32> -> vector<32x16xf32>
    %c2 = arith.constant 2 : index
    %c0_7 = arith.constant 0 : index
    %c0_8 = arith.constant 0 : index
    %7 = vector.load %arg2[%c2, %c0_7, %c0_8] : memref<3x32x32xf32, #tpu.memory_space<vmem>>, vector<1x32x32xf32>
    %8 = vector.shape_cast %7 : vector<1x32x32xf32> to vector<32x32xf32>
    %cst_9 = arith.constant dense<0.000000e+00> : vector<32x16xf32>
    %9 = tpu.matmul %8, %0, %cst_9 {dimension_numbers = #tpu.dot_dimension_numbers<[1], [0], [0], [1], [0, 0, 1, 1], [], []>} : vector<32x32xf32>, vector<32x16xf32>, vector<32x16xf32> -> vector<32x16xf32>
    %10 = tpu.concatenate %3, %6, %9 in 1 : vector<32x16xf32>, vector<32x16xf32>, vector<32x16xf32> -> vector<32x48xf32>
    %c0_10 = arith.constant 0 : index
    %c0_11 = arith.constant 0 : index
    %11 = vector.load %arg3[%c0_10, %c0_11] : memref<48x32xf32, #tpu.memory_space<vmem>>, vector<48x32xf32>
    %cst_12 = arith.constant dense<0.000000e+00> : vector<32x32xf32>
    %12 = tpu.matmul %10, %11, %cst_12 {dimension_numbers = #tpu.dot_dimension_numbers<[1], [0], [0], [1], [0, 0, 1, 1], [], []>} : vector<32x48xf32>, vector<48x32xf32>, vector<32x32xf32> -> vector<32x32xf32>
    %c0_13 = arith.constant 0 : index
    %c0_14 = arith.constant 0 : index
    %13 = vector.load %arg5[%c0_13, %c0_14] : memref<1x32xf32, #tpu.memory_space<vmem>>, vector<1x32xf32>
    %14 = vector.broadcast %13 : vector<1x32xf32> to vector<32x32xf32>
    %15 = arith.addf %12, %14 : vector<32x32xf32>
    %c0_15 = arith.constant 0 : index
    %c0_16 = arith.constant 0 : index
    %16 = vector.load %arg4[%c0_15, %c0_16] : memref<48x32xf32, #tpu.memory_space<vmem>>, vector<48x32xf32>
    %cst_17 = arith.constant dense<0.000000e+00> : vector<32x32xf32>
    %17 = tpu.matmul %10, %16, %cst_17 {dimension_numbers = #tpu.dot_dimension_numbers<[1], [0], [0], [1], [0, 0, 1, 1], [], []>} : vector<32x48xf32>, vector<48x32xf32>, vector<32x32xf32> -> vector<32x32xf32>
    %c0_18 = arith.constant 0 : index
    %c0_19 = arith.constant 0 : index
    %18 = vector.load %arg5[%c0_18, %c0_19] : memref<1x32xf32, #tpu.memory_space<vmem>>, vector<1x32xf32>
    %19 = vector.broadcast %18 : vector<1x32xf32> to vector<32x32xf32>
    %20 = arith.addf %17, %19 : vector<32x32xf32>
    %21 = arith.maximumf %15, %20 : vector<32x32xf32>
    %cst_20 = arith.constant 0.000000e+00 : f32
    %22 = vector.broadcast %cst_20 : f32 to vector<32x32xf32>
    %23 = arith.maximumf %21, %22 : vector<32x32xf32>
    %c0_21 = arith.constant 0 : index
    %c0_22 = arith.constant 0 : index
    %c0_23 = arith.constant 0 : index
    %24 = vector.load %arg6[%c0_21, %c0_22, %c0_23] : memref<3x16x32xf32, #tpu.memory_space<vmem>>, vector<1x16x32xf32>
    %25 = vector.shape_cast %24 : vector<1x16x32xf32> to vector<16x32xf32>
    %cst_24 = arith.constant dense<0.000000e+00> : vector<16x32xf32>
    %26 = tpu.matmul %25, %23, %cst_24 {dimension_numbers = #tpu.dot_dimension_numbers<[1], [0], [0], [1], [0, 0, 1, 1], [], []>} : vector<16x32xf32>, vector<32x32xf32>, vector<16x32xf32> -> vector<16x32xf32>
    %c1_25 = arith.constant 1 : index
    %c0_26 = arith.constant 0 : index
    %c0_27 = arith.constant 0 : index
    %27 = vector.load %arg6[%c1_25, %c0_26, %c0_27] : memref<3x16x32xf32, #tpu.memory_space<vmem>>, vector<1x16x32xf32>
    %28 = vector.shape_cast %27 : vector<1x16x32xf32> to vector<16x32xf32>
    %cst_28 = arith.constant dense<0.000000e+00> : vector<16x32xf32>
    %29 = tpu.matmul %28, %23, %cst_28 {dimension_numbers = #tpu.dot_dimension_numbers<[1], [0], [0], [1], [0, 0, 1, 1], [], []>} : vector<16x32xf32>, vector<32x32xf32>, vector<16x32xf32> -> vector<16x32xf32>
    %c2_29 = arith.constant 2 : index
    %c0_30 = arith.constant 0 : index
    %c0_31 = arith.constant 0 : index
    %30 = vector.load %arg6[%c2_29, %c0_30, %c0_31] : memref<3x16x32xf32, #tpu.memory_space<vmem>>, vector<1x16x32xf32>
    %31 = vector.shape_cast %30 : vector<1x16x32xf32> to vector<16x32xf32>
    %cst_32 = arith.constant dense<0.000000e+00> : vector<16x32xf32>
    %32 = tpu.matmul %31, %23, %cst_32 {dimension_numbers = #tpu.dot_dimension_numbers<[1], [0], [0], [1], [0, 0, 1, 1], [], []>} : vector<16x32xf32>, vector<32x32xf32>, vector<16x32xf32> -> vector<16x32xf32>
    %33 = tpu.concatenate %26, %29, %32 in 1 : vector<16x32xf32>, vector<16x32xf32>, vector<16x32xf32> -> vector<16x96xf32>
    %c0_33 = arith.constant 0 : index
    %c0_34 = arith.constant 0 : index
    %34 = vector.load %arg7[%c0_33, %c0_34] : memref<96x64xf32, #tpu.memory_space<vmem>>, vector<96x64xf32>
    %cst_35 = arith.constant dense<0.000000e+00> : vector<16x64xf32>
    %35 = tpu.matmul %33, %34, %cst_35 {dimension_numbers = #tpu.dot_dimension_numbers<[1], [0], [0], [1], [0, 0, 1, 1], [], []>} : vector<16x96xf32>, vector<96x64xf32>, vector<16x64xf32> -> vector<16x64xf32>
    %c0_36 = arith.constant 0 : index
    %c0_37 = arith.constant 0 : index
    %36 = vector.load %arg8[%c0_36, %c0_37] : memref<1x64xf32, #tpu.memory_space<vmem>>, vector<1x64xf32>
    %37 = vector.broadcast %36 : vector<1x64xf32> to vector<16x64xf32>
    %38 = arith.addf %35, %37 : vector<16x64xf32>
    %cst_38 = arith.constant 0.000000e+00 : f32
    %39 = vector.broadcast %cst_38 : f32 to vector<16x64xf32>
    %40 = arith.maximumf %38, %39 : vector<16x64xf32>
    %c0_39 = arith.constant 0 : index
    %c0_40 = arith.constant 0 : index
    %c0_41 = arith.constant 0 : index
    %41 = vector.load %arg9[%c0_39, %c0_40, %c0_41] : memref<3x8x16xf32, #tpu.memory_space<vmem>>, vector<1x8x16xf32>
    %42 = vector.shape_cast %41 : vector<1x8x16xf32> to vector<8x16xf32>
    %cst_42 = arith.constant dense<0.000000e+00> : vector<8x64xf32>
    %43 = tpu.matmul %42, %40, %cst_42 {dimension_numbers = #tpu.dot_dimension_numbers<[1], [0], [0], [1], [0, 0, 1, 1], [], []>} : vector<8x16xf32>, vector<16x64xf32>, vector<8x64xf32> -> vector<8x64xf32>
    %c1_43 = arith.constant 1 : index
    %c0_44 = arith.constant 0 : index
    %c0_45 = arith.constant 0 : index
    %44 = vector.load %arg9[%c1_43, %c0_44, %c0_45] : memref<3x8x16xf32, #tpu.memory_space<vmem>>, vector<1x8x16xf32>
    %45 = vector.shape_cast %44 : vector<1x8x16xf32> to vector<8x16xf32>
    %cst_46 = arith.constant dense<0.000000e+00> : vector<8x64xf32>
    %46 = tpu.matmul %45, %40, %cst_46 {dimension_numbers = #tpu.dot_dimension_numbers<[1], [0], [0], [1], [0, 0, 1, 1], [], []>} : vector<8x16xf32>, vector<16x64xf32>, vector<8x64xf32> -> vector<8x64xf32>
    %c2_47 = arith.constant 2 : index
    %c0_48 = arith.constant 0 : index
    %c0_49 = arith.constant 0 : index
    %47 = vector.load %arg9[%c2_47, %c0_48, %c0_49] : memref<3x8x16xf32, #tpu.memory_space<vmem>>, vector<1x8x16xf32>
    %48 = vector.shape_cast %47 : vector<1x8x16xf32> to vector<8x16xf32>
    %cst_50 = arith.constant dense<0.000000e+00> : vector<8x64xf32>
    %49 = tpu.matmul %48, %40, %cst_50 {dimension_numbers = #tpu.dot_dimension_numbers<[1], [0], [0], [1], [0, 0, 1, 1], [], []>} : vector<8x16xf32>, vector<16x64xf32>, vector<8x64xf32> -> vector<8x64xf32>
    %50 = tpu.concatenate %43, %46, %49 in 1 : vector<8x64xf32>, vector<8x64xf32>, vector<8x64xf32> -> vector<8x192xf32>
    %c0_51 = arith.constant 0 : index
    %c0_52 = arith.constant 0 : index
    %51 = vector.load %arg10[%c0_51, %c0_52] : memref<192x64xf32, #tpu.memory_space<vmem>>, vector<192x64xf32>
    %cst_53 = arith.constant dense<0.000000e+00> : vector<8x64xf32>
    %52 = tpu.matmul %50, %51, %cst_53 {dimension_numbers = #tpu.dot_dimension_numbers<[1], [0], [0], [1], [0, 0, 1, 1], [], []>} : vector<8x192xf32>, vector<192x64xf32>, vector<8x64xf32> -> vector<8x64xf32>
    %c0_54 = arith.constant 0 : index
    %c0_55 = arith.constant 0 : index
    %53 = vector.load %arg11[%c0_54, %c0_55] : memref<1x64xf32, #tpu.memory_space<vmem>>, vector<1x64xf32>
    %54 = vector.broadcast %53 : vector<1x64xf32> to vector<8x64xf32>
    %55 = arith.addf %52, %54 : vector<8x64xf32>
    %cst_56 = arith.constant 0.000000e+00 : f32
    %56 = vector.broadcast %cst_56 : f32 to vector<8x64xf32>
    %57 = arith.maximumf %55, %56 : vector<8x64xf32>
    %c0_57 = arith.constant 0 : index
    %c0_58 = arith.constant 0 : index
    %c0_59 = arith.constant 0 : index
    %58 = vector.load %arg12[%c0_57, %c0_58, %c0_59] : memref<3x8x8xf32, #tpu.memory_space<vmem>>, vector<1x8x8xf32>
    %59 = vector.shape_cast %58 : vector<1x8x8xf32> to vector<8x8xf32>
    %cst_60 = arith.constant dense<0.000000e+00> : vector<8x64xf32>
    %60 = tpu.matmul %59, %57, %cst_60 {dimension_numbers = #tpu.dot_dimension_numbers<[1], [0], [0], [1], [0, 0, 1, 1], [], []>} : vector<8x8xf32>, vector<8x64xf32>, vector<8x64xf32> -> vector<8x64xf32>
    %c1_61 = arith.constant 1 : index
    %c0_62 = arith.constant 0 : index
    %c0_63 = arith.constant 0 : index
    %61 = vector.load %arg12[%c1_61, %c0_62, %c0_63] : memref<3x8x8xf32, #tpu.memory_space<vmem>>, vector<1x8x8xf32>
    %62 = vector.shape_cast %61 : vector<1x8x8xf32> to vector<8x8xf32>
    %cst_64 = arith.constant dense<0.000000e+00> : vector<8x64xf32>
    %63 = tpu.matmul %62, %57, %cst_64 {dimension_numbers = #tpu.dot_dimension_numbers<[1], [0], [0], [1], [0, 0, 1, 1], [], []>} : vector<8x8xf32>, vector<8x64xf32>, vector<8x64xf32> -> vector<8x64xf32>
    %c2_65 = arith.constant 2 : index
    %c0_66 = arith.constant 0 : index
    %c0_67 = arith.constant 0 : index
    %64 = vector.load %arg12[%c2_65, %c0_66, %c0_67] : memref<3x8x8xf32, #tpu.memory_space<vmem>>, vector<1x8x8xf32>
    %65 = vector.shape_cast %64 : vector<1x8x8xf32> to vector<8x8xf32>
    %cst_68 = arith.constant dense<0.000000e+00> : vector<8x64xf32>
    %66 = tpu.matmul %65, %57, %cst_68 {dimension_numbers = #tpu.dot_dimension_numbers<[1], [0], [0], [1], [0, 0, 1, 1], [], []>} : vector<8x8xf32>, vector<8x64xf32>, vector<8x64xf32> -> vector<8x64xf32>
    %67 = tpu.concatenate %60, %63, %66 in 1 : vector<8x64xf32>, vector<8x64xf32>, vector<8x64xf32> -> vector<8x192xf32>
    %c0_69 = arith.constant 0 : index
    %c0_70 = arith.constant 0 : index
    %68 = vector.load %arg13[%c0_69, %c0_70] : memref<192x64xf32, #tpu.memory_space<vmem>>, vector<192x64xf32>
    %cst_71 = arith.constant dense<0.000000e+00> : vector<8x64xf32>
    %69 = tpu.matmul %67, %68, %cst_71 {dimension_numbers = #tpu.dot_dimension_numbers<[1], [0], [0], [1], [0, 0, 1, 1], [], []>} : vector<8x192xf32>, vector<192x64xf32>, vector<8x64xf32> -> vector<8x64xf32>
    %c0_72 = arith.constant 0 : index
    %c0_73 = arith.constant 0 : index
    %70 = vector.load %arg14[%c0_72, %c0_73] : memref<1x64xf32, #tpu.memory_space<vmem>>, vector<1x64xf32>
    %71 = vector.broadcast %70 : vector<1x64xf32> to vector<8x64xf32>
    %72 = arith.addf %69, %71 : vector<8x64xf32>
    %c0_74 = arith.constant 0 : index
    %c0_75 = arith.constant 0 : index
    %73 = vector.load %arg15[%c0_74, %c0_75] : memref<64x32xf32, #tpu.memory_space<vmem>>, vector<64x32xf32>
    %cst_76 = arith.constant dense<0.000000e+00> : vector<8x32xf32>
    %74 = tpu.matmul %72, %73, %cst_76 {dimension_numbers = #tpu.dot_dimension_numbers<[1], [0], [0], [1], [0, 0, 1, 1], [], []>} : vector<8x64xf32>, vector<64x32xf32>, vector<8x32xf32> -> vector<8x32xf32>
    %c0_77 = arith.constant 0 : index
    %c0_78 = arith.constant 0 : index
    %75 = vector.load %arg16[%c0_77, %c0_78] : memref<1x32xf32, #tpu.memory_space<vmem>>, vector<1x32xf32>
    %76 = vector.broadcast %75 : vector<1x32xf32> to vector<8x32xf32>
    %77 = arith.addf %74, %76 : vector<8x32xf32>
    %c0_79 = arith.constant 0 : index
    %c0_80 = arith.constant 0 : index
    %78 = vector.load %arg18[%c0_79, %c0_80] : memref<8x32xf32, #tpu.memory_space<vmem>>, vector<8x32xf32>
    tpu.vector_store %arg18[%c0_79, %c0_80], %77 {strides = array<i32>} : memref<8x32xf32, #tpu.memory_space<vmem>>, vector<8x32xf32>,
    %c0_81 = arith.constant 0 : index
    %c0_82 = arith.constant 0 : index
    %79 = vector.load %arg1[%c0_81, %c0_82] : memref<2x16xf32, #tpu.memory_space<vmem>>, vector<2x16xf32>
    %c0_83 = arith.constant 0 : index
    %c0_84 = arith.constant 0 : index
    %80 = vector.load %arg17[%c0_83, %c0_84] : memref<16x4xf32, #tpu.memory_space<vmem>>, vector<16x4xf32>
    %cst_85 = arith.constant dense<0.000000e+00> : vector<2x4xf32>
    %81 = tpu.matmul %79, %80, %cst_85 {dimension_numbers = #tpu.dot_dimension_numbers<[1], [0], [0], [1], [0, 0, 1, 1], [], []>} : vector<2x16xf32>, vector<16x4xf32>, vector<2x4xf32> -> vector<2x4xf32>
    %c0_86 = arith.constant 0 : index
    %c0_87 = arith.constant 0 : index
    %82 = vector.load %arg19[%c0_86, %c0_87] : memref<2x4xf32, #tpu.memory_space<vmem>>, vector<2x4xf32>
    tpu.vector_store %arg19[%c0_86, %c0_87], %81 {strides = array<i32>} : memref<2x4xf32, #tpu.memory_space<vmem>>, vector<2x4xf32>,
    return
  }
}

</mosaic_0001>

<bundles_post_ra>
// kernel: tpu_custom_call.1
= control target key start
LH: loop header
LB: loop body
LE: loop exit
PB: predicated region body
PF: predicated region fallthrough
CT: control target
= control target key end

     0   :  { %s1540_s0 = inlined_call_operand.vmem [shape: f32[32,16], index: 0, kind: input, shape index: {}]   ;;  %s1541_s1 = inlined_call_operand.vmem [shape: f32[2,16], index: 1, kind: input, shape index: {}]   ;;  %s1542_s2 = inlined_call_operand.vmem [shape: f32[3,32,32], index: 2, kind: input, shape index: {}]   ;;  %s1543_s3 = inlined_call_operand.vmem [shape: f32[48,32], index: 3, kind: input, shape index: {}]   ;;  %s1544_s4 = inlined_call_operand.vmem [shape: f32[48,32], index: 4, kind: input, shape index: {}]   ;;  %s1545_s5 = inlined_call_operand.vmem [shape: f32[1,32], index: 5, kind: input, shape index: {}]   ;;  %s1546_s6 = inlined_call_operand.vmem [shape: f32[3,16,32], index: 6, kind: input, shape index: {}]   ;;  %s1547_s7 = inlined_call_operand.vmem [shape: f32[96,64], index: 7, kind: input, shape index: {}]   ;;  %s1548_s8 = inlined_call_operand.vmem [shape: f32[1,64], index: 8, kind: input, shape index: {}]   ;;  %s1549_s9 = inlined_call_operand.vmem [shape: f32[3,8,16], index: 9, kind: input, shape index: {}]   ;;  %s1550_s10 = inlined_call_operand.vmem [shape: f32[192,64], index: 10, kind: input, shape index: {}]   ;;  %s1551_s11 = inlined_call_operand.vmem [shape: f32[1,64], index: 11, kind: input, shape index: {}]   ;;  %s1552_s12 = inlined_call_operand.vmem [shape: f32[3,8,8], index: 12, kind: input, shape index: {}]   ;;  %s1553_s13 = inlined_call_operand.vmem [shape: f32[192,64], index: 13, kind: input, shape index: {}]   ;;  %s1554_s14 = inlined_call_operand.vmem [shape: f32[1,64], index: 14, kind: input, shape index: {}]   ;;  %s1555_s15 = inlined_call_operand.vmem [shape: f32[64,32], index: 15, kind: input, shape index: {}]   ;;  %s1556_s16 = inlined_call_operand.vmem [shape: f32[1,32], index: 16, kind: input, shape index: {}]   ;;  %s1557_s17 = inlined_call_operand.vmem [shape: f32[16,4], index: 17, kind: input, shape index: {}]   ;;  %s1558_s18 = inlined_call_operand.hbm [shape: f32[8,32], index: 18, kind: output, shape index: {0}]   ;;  %s1559_s19 = inlined_call_operand.hbm [shape: f32[2,4], index: 19, kind: output, shape index: {1}]  }
   0x1   :  { %1563 = sst [smem:[#allocation8_spill]] %s1540_s0 }
   0x2   :  { %1564 = sst [smem:[#allocation9_spill]] %s1541_s1 }
   0x3   :  { %1565 = sst [smem:[#allocation10_spill]] %s1542_s2 }
   0x4   :  { %1566 = sst [smem:[#allocation11_spill]] %s1543_s3 }
   0x5   :  { %25 = vsyncpa [#allocation3], 0  ;;  %s1567_s20 = sld [smem:[#allocation8_spill]]  ;;  %vm71_vm0 = vcmask 261120  }
   0x6   :  { %s1568_s26 = sld [smem:[#allocation10_spill]] }
   0xb   :  { %v66_v0 = vld [vmem:[%s1567_s20 + $0x18] sm:$0xff]  ;;  %v65_v1 = vld [vmem:[%s1567_s20 + $0x10] sm:$0xff]  ;;  %v64_v2 = vld [vmem:[%s1567_s20 + $0x8] sm:$0xff] }
   0xc   :  { %142 = vmatpush.msra.mxu1 %v66_v0  ;;  %957 = vmatpush.msra.mxu2 %v66_v0  ;;  %v63_v3 = vld [vmem:[%s1567_s20] sm:$0xff]  ;;  %v916_v5 = vld [vmem:[%s1568_s26 + $0x48] sm:$0xff] }
   0xd   :  { %96 = vmatpush.msra.mxu0 %v66_v0  ;;  %v907_v4 = vld [vmem:[%s1568_s26 + $0x20] sm:$0xff] }
   0xe   :  { %143 = vmatpush.msra.mxu1 %v65_v1  ;;  %958 = vmatpush.msra.mxu2 %v65_v1 }
   0xf   :  { %97 = vmatpush.msra.mxu0 %v65_v1 }
  0x10   :  { %144 = vmatpush.msra.mxu1 %v64_v2  ;;  %959 = vmatpush.msra.mxu2 %v64_v2 }
  0x11   :  { %26 = vsyncpa [#allocation5], 0  ;;  %98 = vmatpush.msra.mxu0 %v64_v2  ;;  %v67_v6 = vld [vmem:[%s1568_s26] sm:$0xff]  ;;  %v908_v7 = vld [vmem:[%s1568_s26 + $0x28] sm:$0xff]  ;;  %s1023_s22 = smov 16   ;;  %s1024_s2 = smov 32  }
  0x12   :  { %145 = vmatpush.msra.mxu1 %v63_v3  ;;  %960 = vmatpush.msra.mxu2 %v63_v3  ;;  %v917_v8 = vld [vmem:[%s1568_s26 + $0x50] sm:$0xff]  ;;  %v68_v9 = vld [vmem:[%s1568_s26 + $0x8] sm:$0xff]  ;;  %v918_v11 = vld [vmem:[%s1568_s26 + $0x58] sm:$0xff]  ;;  %s1569_s24 = sld [smem:[#allocation11_spill]]  ;;  %vm237_vm1 = vcmask 130048   ;;  %vm256_vm2 = vcmask 392192  }
  0x13   :  { %911 = vmatmul.msk.f32.vlgmr.msra.gmra.mxu1 %vm71_vm0, %v907_v4  ;;  %920 = vmatmul.msk.f32.vlgmr.msra.gmra.mxu2 %vm71_vm0, %v916_v5  ;;  %v909_v10 = vld [vmem:[%s1568_s26 + $0x30] sm:$0xff]  ;;  %v910_v13 = vld [vmem:[%s1568_s26 + $0x38] sm:$0xff]  ;;  %v915_v14 = vld [vmem:[%s1568_s26 + $0x40] sm:$0xff]  ;;  %vm454_vm3 = vcmask 523264   ;;  %vm473_vm4 = vcmask 785408   ;;  %vm657_vm5 = vcmask 64512  }
  0x14   :  { %188 = vmatpush.msrb.mxu1 %v66_v0  ;;  %99 = vmatpush.msra.mxu0 %v63_v3  ;;  %v69_v12 = vld [vmem:[%s1568_s26 + $0x10] sm:$0xff]  ;;  %v70_v15 = vld [vmem:[%s1568_s26 + $0x18] sm:$0xff]  ;;  %v303_v25 = vld [vmem:[%s1544_s4 + $0x28] sm:$0xff]  ;;  %s1025_s26 = smov 64   ;;  %s1570_s23 = sld [smem:[#allocation9_spill]]  ;;  %vm869_vm6 = vcmask 25600  }
  0x15   :  { %903 = vmatmul.msk.f32.vlgmr.msra.gmra.mxu0 %vm71_vm0, %v67_v6  ;;  %v302_v27 = vld [vmem:[%s1544_s4 + $0x20] sm:$0xff]  ;;  %v301_v29 = vld [vmem:[%s1544_s4 + $0x18] sm:$0xff]  ;;  %v300_v31 = vld [vmem:[%s1544_s4 + $0x10] sm:$0xff]  ;;  %s1027_s28 = smov [#allocation2]  }
  0x16   :  { %189 = vmatpush.msrb.mxu1 %v65_v1  ;;  %314 = vmatpush.msrb.mxu0 %v303_v25  ;;  %v299_v33 = vld [vmem:[%s1544_s4 + $0x8] sm:$0xff]  ;;  %v298_v35 = vld [vmem:[%s1544_s4] sm:$0xff] }
  0x17   :  { %v966_v62 = vld [vmem:[%s1545_s5] ss:$0 sm:$0xff]  ;;  %v466_v25 = vld [vmem:[%s1547_s7 + $0x48] sm:$0xff] }
  0x18   :  { %190 = vmatpush.msrb.mxu1 %v64_v2  ;;  %v251_v24 = vld [vmem:[%s1569_s24 + $0x28] sm:$0xff]  ;;  %v250_v26 = vld [vmem:[%s1569_s24 + $0x20] sm:$0xff]  ;;  %v249_v28 = vld [vmem:[%s1569_s24 + $0x18] sm:$0xff]  ;;  %315 = vmatpush.msrb.mxu0 %v302_v27 }
  0x19   :  { %279 = vmatpush.msra.mxu3 %v251_v24  ;;  %v248_v30 = vld [vmem:[%s1569_s24 + $0x10] sm:$0xff]  ;;  %v247_v32 = vld [vmem:[%s1569_s24 + $0x8] sm:$0xff]  ;;  %v246_v34 = vld [vmem:[%s1569_s24] sm:$0xff] }
  0x1a   :  { %191 = vmatpush.msrb.mxu1 %v63_v3  ;;  %316 = vmatpush.msrb.mxu0 %v301_v29  ;;  %v467_v24 = vld [vmem:[%s1547_s7 + $0x50] sm:$0xff] }
  0x1b   :  { %912 = vmatmul.msk.f32.gmra.mxu1 %vm71_vm0, %v908_v7  ;;  %921 = vmatmul.msk.f32.gmra.mxu2 %vm71_vm0, %v917_v8 }
  0x1c   :  { %280 = vmatpush.msra.mxu3 %v250_v26  ;;  %317 = vmatpush.msrb.mxu0 %v300_v31  ;;  %v465_v26 = vld [vmem:[%s1547_s7 + $0x40] sm:$0xff]  ;;  %v464_v31 = vld [vmem:[%s1547_s7 + $0x38] sm:$0xff] }
  0x1d   :  { %904 = vmatmul.msk.f32.gmra.mxu0 %vm71_vm0, %v68_v9 }
  0x1e   :  { %281 = vmatpush.msra.mxu3 %v249_v28  ;;  %318 = vmatpush.msrb.mxu0 %v299_v33  ;;  %v462_v33 = vld [vmem:[%s1547_s7 + $0x28] sm:$0xff] }
  0x20   :  { %282 = vmatpush.msra.mxu3 %v248_v30  ;;  %319 = vmatpush.msrb.mxu0 %v298_v35  ;;  %v460_v35 = vld [vmem:[%s1547_s7 + $0x18] sm:$0xff] }
  0x22   :  { %283 = vmatpush.msra.mxu3 %v247_v32  ;;  %v463_v32 = vld [vmem:[%s1547_s7 + $0x30] sm:$0xff] }
  0x23   :  { %913 = vmatmul.msk.f32.gmra.mxu1 %vm71_vm0, %v909_v10  ;;  %922 = vmatmul.msk.f32.gmra.mxu2 %vm71_vm0, %v918_v11 }
  0x24   :  { %284 = vmatpush.msra.mxu3 %v246_v34  ;;  %v461_v34 = vld [vmem:[%s1547_s7 + $0x20] sm:$0xff] }
  0x25   :  { %905 = vmatmul.msk.f32.gmra.mxu0 %vm71_vm0, %v69_v12 }
  0x2b   :  { %914 = vmatmul.msk.f32.gmra.mxu1 %vm71_vm0, %v910_v13 }
  0x2d   :  { %906 = vmatmul.msk.f32.gmra.mxu0 %vm71_vm0, %v70_v15 }
  0x33   :  { %919 = vmatmul.msk.f32.vlgmr.msrb.gmra.mxu1 %vm71_vm0, %v915_v14 }
  0x90   :  { %v147_v16 = vpop.f32.mrf.mxu1 }
  0x91   :  { %209 = vrot.lane.b32.xlu0 %v147_v16, %s1023_s22 }
  0x92   :  { %v101_v36 = vpop.f32.mrf.mxu0 }
  0x96   :  { %v196_v17 = vpop.f32.mrf.mxu2 }
  0x98   :  { %v150_v18 = vpop.f32.mrf.mxu1 }
  0x99   :  { %211 = vrot.lane.b32.xlu1 %v150_v18, %s1023_s22  ;;  %v937_v18 = vld [vmem:[%s1546_s6 + $0x20] sm:$0xff] }
  0x9a   :  { %v104_v41 = vpop.f32.mrf.mxu0 }
  0x9e   :  { %v199_v19 = vpop.f32.mrf.mxu2 }
  0xa0   :  { %v153_v20 = vpop.f32.mrf.mxu1 }
  0xa1   :  { %227 = vrot.lane.b32.xlu1 %v196_v17, %s1024_s2  ;;  %213 = vrot.lane.b32.xlu2 %v153_v20, %s1023_s22  ;;  %v933_v17 = vld [vmem:[%s1546_s6 + $0x10] sm:$0xff]  ;;  %v934_v20 = vld [vmem:[%s1546_s6 + $0x18] sm:$0xff] }
  0xa2   :  { %v107_v47 = vpop.f32.mrf.mxu0 }
  0xa6   :  { %v202_v21 = vpop.f32.mrf.mxu2 }
  0xa8   :  { %v156_v22 = vpop.f32.mrf.mxu1 }
  0xa9   :  { %229 = vrot.lane.b32.xlu2 %v199_v19, %s1024_s2  ;;  %231 = vrot.lane.b32.xlu1 %v202_v21, %s1024_s2  ;;  %v341_v19 = vld [vmem:[%s1546_s6] sm:$0xff]  ;;  %v938_v21 = vld [vmem:[%s1546_s6 + $0x28] sm:$0xff] }
  0xaa   :  { %v110_v52 = vpop.f32.mrf.mxu0 }
  0xb0   :  { %v193_v23 = vpop.f32.mrf.mxu1 }
  0xb1   :  { %225 = vrot.lane.b32.xlu0 %v193_v23, %s1024_s2  ;;  %v468_v23 = vld [vmem:[%s1547_s7 + $0x58] sm:$0xff] }
  0xb9   :  { %215 = vrot.lane.b32.xlu0 %v156_v22, %s1023_s22  ;;  %v342_v22 = vld [vmem:[%s1546_s6 + $0x8] sm:$0xff] }
  0xfb   :  { %v214_v43 = vpop.permute.xlu2 %213 }
  0xfc   :  { %v240_v49 = vsel %vm237_vm1, %v107_v47, %v214_v43 }
 0x103   :  { %v210_v37 = vpop.permute.xlu0 %209  ;;  %v230_v48 = vpop.permute.xlu2 %229 }
 0x104   :  { %v238_v39 = vsel %vm237_vm1, %v101_v36, %v210_v37  ;;  %v244_v50 = vsel %vm71_vm0, %v240_v49, %v230_v48  ;;  %v459_v36 = vld [vmem:[%s1547_s7 + $0x10] sm:$0xff]  ;;  %v458_v37 = vld [vmem:[%s1547_s7 + $0x8] sm:$0xff] }
 0x10b   :  { %v212_v38 = vpop.permute.xlu1 %211 }
 0x10c   :  { %v239_v45 = vsel %vm237_vm1, %v104_v41, %v212_v38  ;;  %v457_v38 = vld [vmem:[%s1547_s7] sm:$0xff] }
 0x113   :  { %v228_v44 = vpop.permute.xlu1 %227 }
 0x114   :  { %v243_v46 = vsel %vm71_vm0, %v239_v45, %v228_v44 }
 0x11b   :  { %v232_v54 = vpop.permute.xlu1 %231 }
 0x123   :  { %v226_v40 = vpop.permute.xlu0 %225 }
 0x124   :  { %v242_v42 = vsel %vm71_vm0, %v238_v39, %v226_v40 }
 0x125   :  { %923 = vmatmul.msk.f32.vlgmr.msra.gmra.mxu3 %vm256_vm2, %v242_v42  ;;  %927 = vmatmul.msk.f32.vlgmr.msrb.gmra.mxu0 %vm256_vm2, %v242_v42 }
 0x12b   :  { %v216_v51 = vpop.permute.xlu0 %215 }
 0x12c   :  { %v241_v53 = vsel %vm237_vm1, %v110_v52, %v216_v51 }
 0x12d   :  { %924 = vmatmul.msk.f32.gmra.mxu3 %vm256_vm2, %v243_v46  ;;  %928 = vmatmul.msk.f32.gmra.mxu0 %vm256_vm2, %v243_v46  ;;  %v245_v55 = vsel %vm71_vm0, %v241_v53, %v232_v54 }
 0x135   :  { %925 = vmatmul.msk.f32.gmra.mxu3 %vm256_vm2, %v244_v50  ;;  %929 = vmatmul.msk.f32.gmra.mxu0 %vm256_vm2, %v244_v50  ;;  %v967_v50 = vld [vmem:[%s1548_s8] ss:$0 sm:$0xff] }
 0x13d   :  { %926 = vmatmul.msk.f32.gmra.mxu3 %vm256_vm2, %v245_v55  ;;  %930 = vmatmul.msk.f32.gmra.mxu0 %vm256_vm2, %v245_v55 }
 0x1a2   :  { %v321_v56 = vpop.f32.mrf.mxu0 }
 0x1a3   :  { %v322_v10 = vadd.f32 %v966_v62, %v321_v56  ;;  %v944_v56 = vld [vmem:[%s1549_s9 + $0x8] sm:$0xff] }
 0x1a8   :  { %v286_v57 = vpop.f32.mrf.mxu3 }
 0x1a9   :  { %v287_v6 = vadd.f32 %v966_v62, %v286_v57  ;;  %v505_v57 = vld [vmem:[%s1549_s9] sm:$0xff] }
 0x1aa   :  { %v324_v58 = vpop.f32.mrf.mxu0 }
 0x1ab   :  { %v325_v7 = vadd.f32 %v966_v62, %v324_v58  ;;  %v333_v13 = vmax.f32 %v287_v6, %v322_v10  ;;  %v946_v58 = vld [vmem:[%s1549_s9 + $0x10] sm:$0xff]  ;;  %v593_v6 = vld [vmem:[%s1550_s10 + $0x48] sm:$0xff]  ;;  %v591_v10 = vld [vmem:[%s1550_s10 + $0x38] sm:$0xff] }
 0x1ad   :  { %v337_v16 = vmax.f32 %v333_v13, 0.0  ;;  %v589_v13 = vld [vmem:[%s1550_s10 + $0x28] sm:$0xff] }
 0x1b0   :  { %v289_v59 = vpop.f32.mrf.mxu3 }
 0x1b1   :  { %v290_v2 = vadd.f32 %v966_v62, %v289_v59  ;;  %v599_v59 = vld [vmem:[%s1550_s10 + $0x78] sm:$0xff] }
 0x1b2   :  { %v327_v60 = vpop.f32.mrf.mxu0  ;;  %615 = vmatpush.msra.mxu0 %v599_v59  ;;  %v814_v59 = vld [vmem:[%s1555_s15 + $0x38] sm:$0xff] }
 0x1b3   :  { %v328_v3 = vadd.f32 %v966_v62, %v327_v60  ;;  %v334_v11 = vmax.f32 %v290_v2, %v325_v7  ;;  %v598_v60 = vld [vmem:[%s1550_s10 + $0x70] sm:$0xff]  ;;  %v595_v2 = vld [vmem:[%s1550_s10 + $0x58] sm:$0xff] }
 0x1b4   :  { %616 = vmatpush.msra.mxu0 %v598_v60  ;;  %v602_v7 = vld [vmem:[%s1550_s10 + $0x90] sm:$0xff] }
 0x1b5   :  { %v338_v15 = vmax.f32 %v334_v11, 0.0  ;;  %v600_v11 = vld [vmem:[%s1550_s10 + $0x80] sm:$0xff]  ;;  %v813_v60 = vld [vmem:[%s1555_s15 + $0x30] sm:$0xff] }
 0x1b8   :  { %v292_v61 = vpop.f32.mrf.mxu3 }
 0x1b9   :  { %v293_v0 = vadd.f32 %v966_v62, %v292_v61  ;;  %v597_v61 = vld [vmem:[%s1550_s10 + $0x68] sm:$0xff] }
 0x1ba   :  { %v330_v63 = vpop.f32.mrf.mxu0  ;;  %617 = vmatpush.msra.mxu0 %v597_v61  ;;  %v812_v61 = vld [vmem:[%s1555_s15 + $0x28] sm:$0xff] }
 0x1bb   :  { %v331_v4 = vadd.f32 %v966_v62, %v330_v63  ;;  %v335_v8 = vmax.f32 %v293_v0, %v328_v3  ;;  %v606_v63 = vld [vmem:[%s1550_s10 + $0xb0] sm:$0xff]  ;;  %v596_v0 = vld [vmem:[%s1550_s10 + $0x60] sm:$0xff] }
 0x1bc   :  { %v604_v3 = vld [vmem:[%s1550_s10 + $0xa0] sm:$0xff]  ;;  %618 = vmatpush.msra.mxu0 %v596_v0  ;;  %v810_v0 = vld [vmem:[%s1555_s15 + $0x18] sm:$0xff] }
 0x1bd   :  { %v339_v14 = vmax.f32 %v335_v8, 0.0  ;;  %v592_v8 = vld [vmem:[%s1550_s10 + $0x40] sm:$0xff] }
 0x1be   :  { %619 = vmatpush.msra.mxu0 %v595_v2 }
 0x1c0   :  { %v295_v1 = vpop.f32.mrf.mxu3 }
 0x1c1   :  { %v296_v5 = vadd.f32 %v966_v62, %v295_v1  ;;  %v607_v62 = vld [vmem:[%s1550_s10 + $0xb8] sm:$0xff]  ;;  %v605_v1 = vld [vmem:[%s1550_s10 + $0xa8] sm:$0xff] }
 0x1c3   :  { %v336_v9 = vmax.f32 %v296_v5, %v331_v4  ;;  %v594_v4 = vld [vmem:[%s1550_s10 + $0x50] sm:$0xff]  ;;  %v603_v5 = vld [vmem:[%s1550_s10 + $0x98] sm:$0xff] }
 0x1c4   :  { %620 = vmatpush.msra.mxu0 %v594_v4  ;;  %v809_v4 = vld [vmem:[%s1555_s15 + $0x10] sm:$0xff] }
 0x1c5   :  { %v340_v12 = vmax.f32 %v336_v9, 0.0  ;;  %v601_v9 = vld [vmem:[%s1550_s10 + $0x88] sm:$0xff] }
 0x1c6   :  { %621 = vmatpush.msra.mxu0 %v593_v6  ;;  %v844_v6 = vld [vmem:[%s1557_s17] sm:$0xff] }
 0x1c7   :  { %361 = vmatpush.msra.mxu1 %v340_v12  ;;  %393 = vmatpush.msrb.mxu2 %v340_v12 }
 0x1c8   :  { %425 = vmatpush.msrb.mxu3 %v340_v12  ;;  %622 = vmatpush.msra.mxu0 %v592_v8  ;;  %v590_v12 = vld [vmem:[%s1550_s10 + $0x30] sm:$0xff]  ;;  %v843_v8 = vld [vmem:[%s1570_s23] sm:$0x3] }
 0x1c9   :  { %362 = vmatpush.msra.mxu1 %v339_v14  ;;  %394 = vmatpush.msrb.mxu2 %v339_v14 }
 0x1ca   :  { %426 = vmatpush.msrb.mxu3 %v339_v14  ;;  %623 = vmatpush.msra.mxu0 %v591_v10  ;;  %v588_v14 = vld [vmem:[%s1550_s10 + $0x20] sm:$0xff] }
 0x1cb   :  { %363 = vmatpush.msra.mxu1 %v338_v15  ;;  %395 = vmatpush.msrb.mxu2 %v338_v15 }
 0x1cc   :  { %427 = vmatpush.msrb.mxu3 %v338_v15  ;;  %624 = vmatpush.msra.mxu0 %v590_v12  ;;  %v587_v15 = vld [vmem:[%s1550_s10 + $0x18] sm:$0xff] }
 0x1cd   :  { %364 = vmatpush.msra.mxu1 %v337_v16  ;;  %396 = vmatpush.msrb.mxu2 %v337_v16 }
 0x1ce   :  { %428 = vmatpush.msrb.mxu3 %v337_v16  ;;  %935 = vmatmul.msk.f32.vlgmr.msrb.gmra.mxu2 %vm71_vm0, %v933_v17  ;;  %v586_v16 = vld [vmem:[%s1550_s10 + $0x10] sm:$0xff]  ;;  %v585_v17 = vld [vmem:[%s1550_s10 + $0x8] sm:$0xff] }
 0x1cf   :  { %939 = vmatmul.msk.f32.vlgmr.msrb.gmra.mxu3 %vm71_vm0, %v937_v18  ;;  %931 = vmatmul.msk.f32.vlgmr.msra.gmra.mxu1 %vm71_vm0, %v341_v19 }
 0x1d0   :  { %484 = vmatpush.msrb.mxu1 %v468_v23  ;;  %625 = vmatpush.msra.mxu0 %v589_v13 }
 0x1d2   :  { %485 = vmatpush.msrb.mxu1 %v467_v24  ;;  %626 = vmatpush.msra.mxu0 %v588_v14  ;;  %v968_v24 = vld [vmem:[%s1551_s11] ss:$0 sm:$0xff] }
 0x1d4   :  { %486 = vmatpush.msrb.mxu1 %v466_v25  ;;  %627 = vmatpush.msra.mxu0 %v587_v15  ;;  %v970_v15 = vld [vmem:[%s1556_s16] ss:$0 sm:$0xff] }
 0x1d6   :  { %936 = vmatmul.msk.f32.gmra.mxu2 %vm71_vm0, %v934_v20  ;;  %487 = vmatpush.msrb.mxu1 %v465_v26 }
 0x1d7   :  { %940 = vmatmul.msk.f32.gmra.mxu3 %vm71_vm0, %v938_v21  ;;  %932 = vmatmul.msk.f32.gmra.mxu1 %vm71_vm0, %v342_v22  ;;  %v584_v21 = vld [vmem:[%s1550_s10] sm:$0xff] }
 0x1d8   :  { %488 = vmatpush.msrb.mxu1 %v464_v31  ;;  %628 = vmatpush.msra.mxu0 %v586_v16  ;;  %v656_v31 = vld [vmem:[%s1552_s12] sm:$0xff] }
 0x1da   :  { %489 = vmatpush.msrb.mxu1 %v463_v32  ;;  %629 = vmatpush.msra.mxu0 %v585_v17  ;;  %v952_v32 = vld [vmem:[%s1552_s12 + $0x10] sm:$0xff] }
 0x1dc   :  { %490 = vmatpush.msrb.mxu1 %v462_v33  ;;  %630 = vmatpush.msra.mxu0 %v584_v21  ;;  %v751_v33 = vld [vmem:[%s1553_s13 + $0x78] sm:$0xff] }
 0x1de   :  { %491 = vmatpush.msrb.mxu1 %v461_v34  ;;  %v750_v34 = vld [vmem:[%s1553_s13 + $0x70] sm:$0xff] }
 0x1e0   :  { %492 = vmatpush.msrb.mxu1 %v460_v35  ;;  %v749_v35 = vld [vmem:[%s1553_s13 + $0x68] sm:$0xff] }
 0x1e2   :  { %493 = vmatpush.msrb.mxu1 %v459_v36  ;;  %v759_v36 = vld [vmem:[%s1553_s13 + $0xb8] sm:$0xff] }
 0x1e4   :  { %494 = vmatpush.msrb.mxu1 %v458_v37  ;;  %v748_v37 = vld [vmem:[%s1553_s13 + $0x60] sm:$0xff] }
 0x1e6   :  { %495 = vmatpush.msrb.mxu1 %v457_v38  ;;  %v758_v38 = vld [vmem:[%s1553_s13 + $0xb0] sm:$0xff] }
 0x24c   :  { %v366_v40 = vpop.f32.mrf.mxu1 }
 0x251   :  { %v398_v27 = vpop.f32.mrf.mxu2 }
 0x252   :  { %v430_v28 = vpop.f32.mrf.mxu3  ;;  %438 = vrot.lane.b32.xlu2 %v398_v27, %s1024_s2 }
 0x253   :  { %446 = vrot.lane.b32.xlu0 %v430_v28, %s1025_s26 }
 0x254   :  { %v369_v44 = vpop.f32.mrf.mxu1 }
 0x259   :  { %v401_v29 = vpop.f32.mrf.mxu2 }
 0x25a   :  { %440 = vrot.lane.b32.xlu1 %v401_v29, %s1024_s2  ;;  %v433_v30 = vpop.f32.mrf.mxu3 }
 0x25b   :  { %448 = vrot.lane.b32.xlu2 %v433_v30, %s1025_s26  ;;  %v950_v30 = vld [vmem:[%s1552_s12 + $0x8] sm:$0xff]  ;;  %s876_s12 = sshll.u32 %s1027_s28, 4  ;;  %s877_s12 = int_to_ptr.vmem [resolvable:$true] %s876_s12 }
 0x2ac   :  { %v439_v39 = vpop.permute.xlu2 %438 }
 0x2ad   :  { %v452_v41 = vsel %vm71_vm0, %v366_v40, %v439_v39  ;;  %v757_v39 = vld [vmem:[%s1553_s13 + $0xa8] sm:$0xff]  ;;  %v747_v40 = vld [vmem:[%s1553_s13 + $0x58] sm:$0xff] }
 0x2b5   :  { %v449_v45 = vpop.permute.xlu2 %448 }
 0x2c5   :  { %v447_v42 = vpop.permute.xlu0 %446 }
 0x2c6   :  { %v455_v43 = vsel %vm454_vm3, %v452_v41, %v447_v42  ;;  %v756_v41 = vld [vmem:[%s1553_s13 + $0xa0] sm:$0xff]  ;;  %v746_v42 = vld [vmem:[%s1553_s13 + $0x50] sm:$0xff] }
 0x2c7   :  { %941 = vmatmul.msk.f32.vlgmr.msrb.gmra.mxu1 %vm473_vm4, %v455_v43  ;;  %v755_v43 = vld [vmem:[%s1553_s13 + $0x98] sm:$0xff] }
 0x2cc   :  { %v441_v46 = vpop.permute.xlu1 %440 }
 0x2cd   :  { %v453_v47 = vsel %vm71_vm0, %v369_v44, %v441_v46  ;;  %v745_v44 = vld [vmem:[%s1553_s13 + $0x48] sm:$0xff]  ;;  %v744_v46 = vld [vmem:[%s1553_s13 + $0x40] sm:$0xff] }
 0x2ce   :  { %v456_v48 = vsel %vm454_vm3, %v453_v47, %v449_v45  ;;  %v754_v45 = vld [vmem:[%s1553_s13 + $0x90] sm:$0xff]  ;;  %v743_v47 = vld [vmem:[%s1553_s13 + $0x38] sm:$0xff] }
 0x2cf   :  { %942 = vmatmul.msk.f32.gmra.mxu1 %vm473_vm4, %v456_v48  ;;  %v742_v48 = vld [vmem:[%s1553_s13 + $0x30] sm:$0xff] }
 0x344   :  { %v497_v49 = vpop.f32.mrf.mxu1 }
 0x345   :  { %v498_v52 = vadd.f32 %v967_v50, %v497_v49  ;;  %v741_v49 = vld [vmem:[%s1553_s13 + $0x28] sm:$0xff] }
 0x347   :  { %v503_v55 = vmax.f32 %v498_v52, 0.0  ;;  %v738_v52 = vld [vmem:[%s1553_s13 + $0x10] sm:$0xff] }
 0x34c   :  { %v500_v51 = vpop.f32.mrf.mxu1 }
 0x34d   :  { %v501_v53 = vadd.f32 %v967_v50, %v500_v51  ;;  %v740_v50 = vld [vmem:[%s1553_s13 + $0x20] sm:$0xff]  ;;  %v739_v51 = vld [vmem:[%s1553_s13 + $0x18] sm:$0xff] }
 0x34f   :  { %v504_v54 = vmax.f32 %v501_v53, 0.0  ;;  %v737_v53 = vld [vmem:[%s1553_s13 + $0x8] sm:$0xff] }
 0x351   :  { %523 = vmatpush.msra.mxu2 %v504_v54  ;;  %548 = vmatpush.msra.mxu3 %v504_v54 }
 0x353   :  { %524 = vmatpush.msra.mxu2 %v503_v55  ;;  %549 = vmatpush.msra.mxu3 %v503_v55 }
 0x354   :  { %945 = vmatmul.msk.f32.vlgmr.msra.gmra.mxu3 %vm237_vm1, %v944_v56  ;;  %943 = vmatmul.msk.f32.vlgmr.msra.gmra.mxu2 %vm237_vm1, %v505_v57  ;;  %v753_v56 = vld [vmem:[%s1553_s13 + $0x88] sm:$0xff] }
 0x355   :  { %573 = vmatpush.msrb.mxu2 %v504_v54  ;;  %643 = vmatpush.msrb.mxu3 %v607_v62  ;;  %v845_v62 = vld [vmem:[%s1557_s17 + $0x8] sm:$0xff]  ;;  %s1026_s17 = smov [#allocation4]  }
 0x357   :  { %574 = vmatpush.msrb.mxu2 %v503_v55  ;;  %644 = vmatpush.msrb.mxu3 %v606_v63  ;;  %v736_v55 = vld [vmem:[%s1553_s13] sm:$0xff] }
 0x358   :  { %v811_v63 = vld [vmem:[%s1555_s15 + $0x20] sm:$0xff] }
 0x359   :  { %645 = vmatpush.msrb.mxu3 %v605_v1 }
 0x35b   :  { %646 = vmatpush.msrb.mxu3 %v604_v3 }
 0x35c   :  { %947 = vmatmul.msk.f32.vlgmr.msrb.gmra.mxu2 %vm237_vm1, %v946_v58  ;;  %v752_v58 = vld [vmem:[%s1553_s13 + $0x80] sm:$0xff]  ;;  %s878_s13 = sshll.u32 %s1558_s18, 4  ;;  %s879_s13 = int_to_ptr.hbm [resolvable:$true] %s878_s13 }
 0x35d   :  { %647 = vmatpush.msrb.mxu3 %v603_v5  ;;  %v808_v5 = vld [vmem:[%s1555_s15 + $0x8] sm:$0xff] }
 0x35f   :  { %648 = vmatpush.msrb.mxu3 %v602_v7  ;;  %v807_v7 = vld [vmem:[%s1555_s15] sm:$0xff]  ;;  %s887_s15 = sshll.u32 %s1026_s17, 4  ;;  %s888_s15 = int_to_ptr.vmem [resolvable:$true] %s887_s15 }
 0x361   :  { %649 = vmatpush.msrb.mxu3 %v601_v9  ;;  %v969_v9 = vld [vmem:[%s1554_s14] ss:$0 sm:$0xff] }
 0x363   :  { %650 = vmatpush.msrb.mxu3 %v600_v11 }
 0x365   :  { %795 = vmatpush.msra.mxu3 %v759_v36 }
 0x367   :  { %796 = vmatpush.msra.mxu3 %v758_v38 }
 0x369   :  { %797 = vmatpush.msra.mxu3 %v757_v39 }
 0x36b   :  { %798 = vmatpush.msra.mxu3 %v756_v41 }
 0x36d   :  { %799 = vmatpush.msra.mxu3 %v755_v43 }
 0x36f   :  { %800 = vmatpush.msra.mxu3 %v754_v45 }
 0x371   :  { %801 = vmatpush.msra.mxu3 %v753_v56 }
 0x373   :  { %802 = vmatpush.msra.mxu3 %v752_v58 }
 0x3d7   :  { %v551_v18 = vpop.f32.mrf.mxu3  ;;  %v526_v19 = vpop.f32.mrf.mxu2 }
 0x3d8   :  { %580 = vrot.lane.b32.xlu0 %v551_v18, %s1025_s26 }
 0x3df   :  { %v576_v20 = vpop.f32.mrf.mxu2 }
 0x3e0   :  { %948 = vmatmul.msk.f32.vlgmr.msrb.gmra.mxu3 %vm454_vm3, %v576_v20 }
 0x44a   :  { %v581_v22 = vpop.permute.xlu0 %580 }
 0x44b   :  { %v583_v23 = vsel %vm454_vm3, %v526_v19, %v581_v22 }
 0x44c   :  { %631 = vmatmul.f32.vlgmr.msra.gmra.mxu0 %v583_v23 }
 0x463   :  { %v652_v26 = vpop.f32.mrf.mxu3 }
 0x4c9   :  { %v632_v25 = vpop.f32.mrf.mxu0 }
 0x4ca   :  { %v633_v27 = vadd.f32 %v968_v24, %v632_v25 }
 0x4cc   :  { %v653_v28 = vadd.f32 %v652_v26, %v633_v27 }
 0x4ce   :  { %v655_v29 = vmax.f32 %v653_v28, 0.0 }
 0x4d0   :  { %676 = vmatpush.msra.mxu2 %v655_v29  ;;  %701 = vmatpush.msrb.mxu0 %v655_v29 }
 0x4d1   :  { %726 = vmatpush.msra.mxu1 %v655_v29  ;;  %951 = vmatmul.msk.f32.vlgmr.msrb.gmra.mxu0 %vm657_vm5, %v950_v30 }
 0x4d2   :  { %949 = vmatmul.msk.f32.vlgmr.msra.gmra.mxu2 %vm657_vm5, %v656_v31  ;;  %953 = vmatmul.msk.f32.vlgmr.msra.gmra.mxu1 %vm657_vm5, %v952_v32 }
 0x4d3   :  { %767 = vmatpush.msrb.mxu2 %v751_v33  ;;  %830 = vmatpush.msra.mxu0 %v814_v59 }
 0x4d4   :  { %863 = vmatpush.msrb.mxu1 %v845_v62 }
 0x4d5   :  { %768 = vmatpush.msrb.mxu2 %v750_v34  ;;  %831 = vmatpush.msra.mxu0 %v813_v60 }
 0x4d6   :  { %864 = vmatpush.msrb.mxu1 %v844_v6 }
 0x4d7   :  { %769 = vmatpush.msrb.mxu2 %v749_v35  ;;  %832 = vmatpush.msra.mxu0 %v812_v61 }
 0x4d9   :  { %770 = vmatpush.msrb.mxu2 %v748_v37  ;;  %833 = vmatpush.msra.mxu0 %v811_v63 }
 0x4da   :  { %956 = vmatmul.msk.f32.vlgmr.msrb.gmra.mxu1 %vm237_vm1, %v843_v8 }
 0x4db   :  { %771 = vmatpush.msrb.mxu2 %v747_v40  ;;  %834 = vmatpush.msra.mxu0 %v810_v0 }
 0x4dd   :  { %772 = vmatpush.msrb.mxu2 %v746_v42  ;;  %835 = vmatpush.msra.mxu0 %v809_v4 }
 0x4df   :  { %773 = vmatpush.msrb.mxu2 %v745_v44  ;;  %836 = vmatpush.msra.mxu0 %v808_v5 }
 0x4e1   :  { %774 = vmatpush.msrb.mxu2 %v744_v46  ;;  %837 = vmatpush.msra.mxu0 %v807_v7 }
 0x4e3   :  { %775 = vmatpush.msrb.mxu2 %v743_v47 }
 0x4e5   :  { %776 = vmatpush.msrb.mxu2 %v742_v48 }
 0x4e7   :  { %777 = vmatpush.msrb.mxu2 %v741_v49 }
 0x4e9   :  { %778 = vmatpush.msrb.mxu2 %v740_v50 }
 0x4eb   :  { %779 = vmatpush.msrb.mxu2 %v739_v51 }
 0x4ed   :  { %780 = vmatpush.msrb.mxu2 %v738_v52 }
 0x4ef   :  { %781 = vmatpush.msrb.mxu2 %v737_v53 }
 0x4f1   :  { %782 = vmatpush.msrb.mxu2 %v736_v55 }
 0x54e   :  { %v703_v54 = vpop.f32.mrf.mxu0 }
 0x54f   :  { %732 = vrot.lane.b32.xlu1 %v703_v54, %s1025_s26  ;;  %v728_v57 = vpop.f32.mrf.mxu1  ;;  %s889_s26 = sshll.u32 %s1559_s19, 4  ;;  %s890_s26 = int_to_ptr.hbm [resolvable:$true] %s889_s26 }
 0x550   :  { %954 = vmatmul.msk.f32.vlgmr.msra.gmra.mxu3 %vm454_vm3, %v728_v57 }
 0x555   :  { %v678_v1 = vpop.f32.mrf.mxu2 }
 0x557   :  { %v866_v14 = vpop.f32.mrf.mxu1 }
 0x558   :  { %870 = vst.msk [vmem:[#allocation4] sm:$0x3] %vm869_vm6, %v866_v14 }
 0x559   :  { %892 = dma.vmem_to_hbm [thread:$0]  %s888_s15, 32, %s890_s26, [#allocation5]  }
 0x5c1   :  { %v733_v2 = vpop.permute.xlu1 %732 }
 0x5c2   :  { %v735_v3 = vsel %vm454_vm3, %v678_v1, %v733_v2 }
 0x5c3   :  { %783 = vmatmul.f32.vlgmr.msrb.gmra.mxu2 %v735_v3 }
 0x5d3   :  { %v804_v11 = vpop.f32.mrf.mxu3 }
 0x646   :  { %v784_v10 = vpop.f32.mrf.mxu2 }
 0x647   :  { %v785_v12 = vadd.f32 %v969_v9, %v784_v10 }
 0x649   :  { %v805_v13 = vadd.f32 %v804_v11, %v785_v12 }
 0x64b   :  { %955 = vmatmul.msk.f32.vlgmr.msra.gmra.mxu0 %vm454_vm3, %v805_v13 }
 0x6c8   :  { %v839_v16 = vpop.f32.mrf.mxu0 }
 0x6c9   :  { %v840_v17 = vadd.f32 %v970_v15, %v839_v16 }
 0x6cb   :  { %842 = vst.msk [vmem:[#allocation2] sm:$0xff] %vm71_vm0, %v840_v17 }
 0x6cc   :  { %881 = dma.vmem_to_hbm [thread:$0]  %s877_s12, 128, %s879_s13, [#allocation3]  }
 0x6cd   :  { %1019 = dma.done.wait [#allocation3], 128  }
 0x6ce   :  { %1020 = vsyncadd [#allocation3], 4294967168 }
 0x6cf   :  { %1021 = dma.done.wait [#allocation5], 32  }
 0x6d0   :  { %1022 = vsyncadd [#allocation5], 4294967264 }
 0x6d1   :  { %901 = vsyncpa [#allocation3], 1 }
 0x6d2   :  { %902 = vsyncpa [#allocation5], 1 }

</bundles_post_ra>
